<compile_context>
chip_gen: v7x
topology: tpu7x:2x2x1
jax: 0.10.0
libtpu: 0.0.40
codegen_flags: <defaults>
</compile_context>

<pallas_src>
import functools
import math

import jax
import jax.numpy as jnp
from jax import lax
from jax.experimental import pallas as pl
from jax.experimental.pallas import tpu as pltpu


def _round_up(x, m):
    return ((x + m - 1) // m) * m


def _flash_attention_kernel(vl_ref, q_ref, k_ref, v_ref, o_ref,
                            m_sc, l_sc, acc_sc, *, scale, tk):
    """One grid step == (batch b, query tile qi, key tile ki).

    vl_ref : SMEM (B,) int32     -- scalar-prefetched valid lengths
    q_ref  : VMEM (1, TQ, Dp)
    k_ref  : VMEM (1, TK, Dp)
    v_ref  : VMEM (1, TK, Dvp)
    o_ref  : VMEM (1, TQ, Dvp)   -- resident across the K axis, written at last ki
    m_sc   : VMEM (TQ, 1) f32    -- running row max
    l_sc   : VMEM (TQ, 1) f32    -- running softmax denominator
    acc_sc : VMEM (TQ, Dvp) f32  -- running weighted sum of values
    """
    b = pl.program_id(0)
    ki = pl.program_id(2)

    @pl.when(ki == 0)
    def _init():
        m_sc[...] = jnp.full_like(m_sc, -jnp.inf)
        l_sc[...] = jnp.zeros_like(l_sc)
        acc_sc[...] = jnp.zeros_like(acc_sc)

    # Fold 1/sqrt(d) into q (TQ*D multiplies) instead of scaling the (TQ, TK)
    # score matrix (TQ*TK ops).
    q = q_ref[0] * scale                       # (TQ, D)
    k = k_ref[0]                               # (TK, D)
    v = v_ref[0]                               # (TK, Dv)

    # q @ k^T, contracting the last dims of both operands -> no explicit k.T.
    s = lax.dot_general(
        q, k, dimension_numbers=(((1,), (1,)), ((), ())),
        preferred_element_type=jnp.float32,
    )                                          # (TQ, TK) f32

    # d2l.masked_softmax semantics for 1-D valid_lens: key positions >= valid
    # length get -1e6 before the softmax (padded key rows are masked too).
    valid = vl_ref[b]
    col = ki * tk + lax.broadcasted_iota(jnp.int32, s.shape, 1)
    s = jnp.where(col < valid, s, jnp.float32(-1e6))

    # Online (flash) softmax update.
    m_prev = m_sc[...]
    m_new = jnp.maximum(m_prev, jnp.max(s, axis=-1, keepdims=True))
    alpha = jnp.exp(m_prev - m_new)
    p = jnp.exp(s - m_new)                     # (TQ, TK)

    l_sc[...] = alpha * l_sc[...] + jnp.sum(p, axis=-1, keepdims=True)
    acc_sc[...] = alpha * acc_sc[...] + jnp.dot(
        p.astype(v.dtype), v, preferred_element_type=jnp.float32)
    m_sc[...] = m_new

    @pl.when(ki == pl.num_programs(2) - 1)
    def _finalize():
        # EUP approximate reciprocal + two Newton steps (~f32 accuracy) keeps
        # the divide off the VALU; it only runs once per (b, q-tile).
        l = l_sc[...]
        inv = pl.reciprocal(l, approx=True)
        inv = inv * (2.0 - l * inv)
        inv = inv * (2.0 - l * inv)
        # TODO(synk): nn.Dropout is identity in eval mode; training-mode dropout
        # is not applied here.
        o_ref[0] = (acc_sc[...] * inv).astype(o_ref.dtype)


def dot_product_attention(queries, keys, values, valid_lens=None, *, tq=None, tk=None):
    """scores = QK^T / sqrt(d); masked softmax over keys; weights @ V."""
    B, Q, D = queries.shape
    _, K, _ = keys.shape
    Dv = values.shape[-1]

    if valid_lens is None:
        valid_lens = jnp.full((B,), K, dtype=jnp.int32)
    # TODO(synk): 2-D (per-batch, per-query) valid_lens variant of
    # d2l.masked_softmax is not supported by this kernel.

    # Tile sizes: sublane tile (tq) multiple of 8, lane tiles multiples of 128.
    # Chosen to fit v7x's 64 MiB physical VMEM with ample headroom.
    if tq is None:
        tq = min(256, _round_up(Q, 8))
    if tk is None:
        tk = min(512, _round_up(K, 128))

    Qp = _round_up(Q, tq)
    Kp = _round_up(K, tk)
    Dp = _round_up(D, 128)
    Dvp = _round_up(Dv, 128)

    # Zero-pad: extra D columns contribute nothing to QK^T, padded key rows are
    # masked (index >= valid_len <= K), padded Q rows / Dv columns are sliced off.
    qp = jnp.pad(queries, ((0, 0), (0, Qp - Q), (0, Dp - D)))
    kp = jnp.pad(keys, ((0, 0), (0, Kp - K), (0, Dp - D)))
    vp = jnp.pad(values, ((0, 0), (0, Kp - K), (0, Dvp - Dv)))

    grid = (B, Qp // tq, Kp // tk)
    scale = 1.0 / math.sqrt(D)

    kernel = functools.partial(_flash_attention_kernel, scale=scale, tk=tk)

    grid_spec = pltpu.PrefetchScalarGridSpec(
        num_scalar_prefetch=1,
        grid=grid,
        in_specs=[
            pl.BlockSpec((1, tq, Dp), lambda b, qi, ki, vl: (b, qi, 0)),
            pl.BlockSpec((1, tk, Dp), lambda b, qi, ki, vl: (b, ki, 0)),
            pl.BlockSpec((1, tk, Dvp), lambda b, qi, ki, vl: (b, ki, 0)),
        ],
        out_specs=pl.BlockSpec((1, tq, Dvp), lambda b, qi, ki, vl: (b, qi, 0)),
        scratch_shapes=[
            pltpu.VMEM((tq, 1), jnp.float32),     # running max
            pltpu.VMEM((tq, 1), jnp.float32),     # running denominator
            pltpu.VMEM((tq, Dvp), jnp.float32),   # output accumulator
        ],
    )

    out = pl.pallas_call(
        kernel,
        out_shape=jax.ShapeDtypeStruct((B, Qp, Dvp), queries.dtype),
        grid_spec=grid_spec,
        compiler_params=pltpu.CompilerParams(
            # batch & Q-tile axes shard across v7x's two TensorCores; the key
            # axis is the sequential online-softmax reduction.
            dimension_semantics=("parallel", "parallel", "arbitrary"),
            vmem_limit_bytes=48 * 1024 * 1024,
        ),
    )(valid_lens.astype(jnp.int32), qp, kp, vp)

    return out[:, :Q, :Dv]


def _reference(queries, keys, values, valid_lens):
    d = queries.shape[-1]
    scores = jnp.einsum("bqd,bkd->bqk", queries, keys) / math.sqrt(d)
    col = jnp.arange(keys.shape[1])[None, None, :]
    mask = col < valid_lens[:, None, None]
    masked = jnp.where(mask, scores, -1e6)
    w = jax.nn.softmax(masked, axis=-1)
    return jnp.einsum("bqk,bkv->bqv", w, values)


if __name__ == "__main__":
    key = jax.random.PRNGKey(0)

    # Case 1: mirrors the PyTorch / d2l example:
    #   queries = normal(0, 1, (2, 1, 2)); keys = ones((2, 10, 2))
    #   values  = arange(40).reshape(1, 10, 4).repeat(2, 1, 1); valid_lens = [2, 6]
    queries = jax.random.normal(key, (2, 1, 2), dtype=jnp.float32)
    keys = jnp.ones((2, 10, 2), dtype=jnp.float32)
    values = jnp.tile(jnp.arange(40, dtype=jnp.float32).reshape(1, 10, 4), (2, 1, 1))
    valid_lens = jnp.array([2, 6], dtype=jnp.int32)

    out = jax.block_until_ready(dot_product_attention(queries, keys, values, valid_lens))
    ref = _reference(queries, keys, values, valid_lens)
    assert jnp.allclose(out, ref, atol=1e-4, rtol=1e-4), "case 1 output mismatch"

    # Case 2: small random shapes with forced tiling over Q and K to exercise
    # the online-softmax accumulation across multiple key tiles.
    k1, k2, k3 = jax.random.split(key, 3)
    q2 = jax.random.normal(k1, (2, 20, 16), dtype=jnp.float32)
    kk2 = jax.random.normal(k2, (2, 300, 16), dtype=jnp.float32)
    v2 = jax.random.normal(k3, (2, 300, 24), dtype=jnp.float32)
    vl2 = jnp.array([7, 260], dtype=jnp.int32)

    out2 = jax.block_until_ready(dot_product_attention(q2, kk2, v2, vl2, tq=8, tk=128))
    ref2 = _reference(q2, kk2, v2, vl2)
    # Looser tolerance: MXU default matmul precision vs XLA's einsum lowering.
    assert jnp.allclose(out2, ref2, atol=2e-2, rtol=2e-2), "case 2 output mismatch"

    print("KERNEL_OK")
</pallas_src>

<mosaic_0001>
module attributes {stable_mosaic.version = 11 : i64} {
  func.func @_flash_attention_kernel(%arg0: i32, %arg1: i32, %arg2: i32, %arg3: memref<2xi32, #tpu.memory_space<smem>>, %arg4: memref<1x8x128xf32, #tpu.memory_space<vmem>>, %arg5: memref<1x128x128xf32, #tpu.memory_space<vmem>>, %arg6: memref<1x128x128xf32, #tpu.memory_space<vmem>>, %arg7: memref<1x8x128xf32, #tpu.memory_space<vmem>>, %arg8: memref<8x1xf32, #tpu.memory_space<vmem>>, %arg9: memref<8x1xf32, #tpu.memory_space<vmem>>, %arg10: memref<8x128xf32, #tpu.memory_space<vmem>>) attributes {dimension_semantics = [#tpu.dimension_semantics<parallel>, #tpu.dimension_semantics<parallel>, #tpu.dimension_semantics<arbitrary>], iteration_bounds = array<i64: 2, 1, 1>, scalar_prefetch = 1 : i64, scratch_operands = 3 : i64, tpu.core_type = #tpu.core_type<tc>, window_params = [{transform_indices = @transform_0, window_bounds = array<i64: 1, 8, 128>}, {transform_indices = @transform_1, window_bounds = array<i64: 1, 128, 128>}, {transform_indices = @transform_2, window_bounds = array<i64: 1, 128, 128>}, {transform_indices = @transform_3, window_bounds = array<i64: 1, 8, 128>}]} {
    %c0_i32 = arith.constant 0 : i32
    %0 = arith.cmpi eq, %arg2, %c0_i32 : i32
    %1 = arith.extui %0 : i1 to i32
    %c0_i32_0 = arith.constant 0 : i32
    %2 = arith.cmpi ne, %1, %c0_i32_0 : i32
    scf.if %2 {
      %cst_28 = arith.constant 0xFF800000 : f32
      %47 = vector.broadcast %cst_28 : f32 to vector<8x1xf32>
      %c0_29 = arith.constant 0 : index
      %c0_30 = arith.constant 0 : index
      %48 = vector.load %arg8[%c0_29, %c0_30] : memref<8x1xf32, #tpu.memory_space<vmem>>, vector<8x1xf32>
      tpu.vector_store %arg8[%c0_29, %c0_30], %47 {strides = array<i32>} : memref<8x1xf32, #tpu.memory_space<vmem>>, vector<8x1xf32>,
      %cst_31 = arith.constant 0.000000e+00 : f32
      %49 = vector.broadcast %cst_31 : f32 to vector<8x1xf32>
      %c0_32 = arith.constant 0 : index
      %c0_33 = arith.constant 0 : index
      %50 = vector.load %arg9[%c0_32, %c0_33] : memref<8x1xf32, #tpu.memory_space<vmem>>, vector<8x1xf32>
      tpu.vector_store %arg9[%c0_32, %c0_33], %49 {strides = array<i32>} : memref<8x1xf32, #tpu.memory_space<vmem>>, vector<8x1xf32>,
      %cst_34 = arith.constant 0.000000e+00 : f32
      %51 = vector.broadcast %cst_34 : f32 to vector<8x128xf32>
      %c0_35 = arith.constant 0 : index
      %c0_36 = arith.constant 0 : index
      %52 = vector.load %arg10[%c0_35, %c0_36] : memref<8x128xf32, #tpu.memory_space<vmem>>, vector<8x128xf32>
      tpu.vector_store %arg10[%c0_35, %c0_36], %51 {strides = array<i32>} : memref<8x128xf32, #tpu.memory_space<vmem>>, vector<8x128xf32>,
    } else {
    }
    %c0 = arith.constant 0 : index
    %c0_1 = arith.constant 0 : index
    %c0_2 = arith.constant 0 : index
    %3 = vector.load %arg4[%c0, %c0_1, %c0_2] : memref<1x8x128xf32, #tpu.memory_space<vmem>>, vector<1x8x128xf32>
    %4 = vector.shape_cast %3 : vector<1x8x128xf32> to vector<8x128xf32>
    %cst = arith.constant 0.707106769 : f32
    %5 = vector.broadcast %cst : f32 to vector<8x128xf32>
    %6 = arith.mulf %4, %5 : vector<8x128xf32>
    %c0_3 = arith.constant 0 : index
    %c0_4 = arith.constant 0 : index
    %c0_5 = arith.constant 0 : index
    %7 = vector.load %arg5[%c0_3, %c0_4, %c0_5] : memref<1x128x128xf32, #tpu.memory_space<vmem>>, vector<1x128x128xf32>
    %8 = vector.shape_cast %7 : vector<1x128x128xf32> to vector<128x128xf32>
    %c0_6 = arith.constant 0 : index
    %c0_7 = arith.constant 0 : index
    %c0_8 = arith.constant 0 : index
    %9 = vector.load %arg6[%c0_6, %c0_7, %c0_8] : memref<1x128x128xf32, #tpu.memory_space<vmem>>, vector<1x128x128xf32>
    %10 = vector.shape_cast %9 : vector<1x128x128xf32> to vector<128x128xf32>
    %cst_9 = arith.constant dense<0.000000e+00> : vector<8x128xf32>
    %11 = tpu.matmul %6, %8, %cst_9 {dimension_numbers = #tpu.dot_dimension_numbers<[1], [1], [0], [0], [0, 0, 1, 0], [], []>} : vector<8x128xf32>, vector<128x128xf32>, vector<8x128xf32> -> vector<8x128xf32>
    %12 = arith.index_cast %arg0 : i32 to index
    %13 = memref.load %arg3[%12] : memref<2xi32, #tpu.memory_space<smem>>
    %c128_i32 = arith.constant 128 : i32
    %14 = arith.muli %arg2, %c128_i32 : i32
    %15 = tpu.iota {dimensions = array<i32: 1>} : vector<8x128xi32>
    %16 = vector.broadcast %14 : i32 to vector<8x128xi32>
    %17 = arith.addi %16, %15 : vector<8x128xi32>
    %18 = vector.broadcast %13 : i32 to vector<8x128xi32>
    %19 = arith.cmpi slt, %17, %18 : vector<8x128xi32>
    %cst_10 = arith.constant -1.000000e+06 : f32
    %20 = vector.broadcast %cst_10 : f32 to vector<8x128xf32>
    %21 = arith.select %19, %11, %20 : vector<8x128xi1>, vector<8x128xf32>
    %c0_11 = arith.constant 0 : index
    %c0_12 = arith.constant 0 : index
    %22 = vector.load %arg8[%c0_11, %c0_12] : memref<8x1xf32, #tpu.memory_space<vmem>>, vector<8x1xf32>
    %cst_13 = arith.constant dense<0xFF800000> : vector<8xf32>
    %23 = vector.multi_reduction <maximumf>, %21, %cst_13 [1] : vector<8x128xf32> to vector<8xf32>
    %24 = vector.shape_cast %23 : vector<8xf32> to vector<8x1xf32>
    %25 = arith.maximumf %22, %24 : vector<8x1xf32>
    %26 = arith.subf %22, %25 : vector<8x1xf32>
    %27 = math.exp %26 : vector<8x1xf32>
    %28 = vector.broadcast %25 : vector<8x1xf32> to vector<8x128xf32>
    %29 = arith.subf %21, %28 : vector<8x128xf32>
    %30 = math.exp %29 : vector<8x128xf32>
    %c0_14 = arith.constant 0 : index
    %c0_15 = arith.constant 0 : index
    %31 = vector.load %arg9[%c0_14, %c0_15] : memref<8x1xf32, #tpu.memory_space<vmem>>, vector<8x1xf32>
    %32 = arith.mulf %27, %31 : vector<8x1xf32>
    %cst_16 = arith.constant dense<0.000000e+00> : vector<8xf32>
    %33 = vector.multi_reduction <add>, %30, %cst_16 [1] : vector<8x128xf32> to vector<8xf32>
    %34 = vector.shape_cast %33 : vector<8xf32> to vector<8x1xf32>
    %35 = arith.addf %32, %34 : vector<8x1xf32>
    %c0_17 = arith.constant 0 : index
    %c0_18 = arith.constant 0 : index
    %36 = vector.load %arg9[%c0_17, %c0_18] : memref<8x1xf32, #tpu.memory_space<vmem>>, vector<8x1xf32>
    tpu.vector_store %arg9[%c0_17, %c0_18], %35 {strides = array<i32>} : memref<8x1xf32, #tpu.memory_space<vmem>>, vector<8x1xf32>,
    %c0_19 = arith.constant 0 : index
    %c0_20 = arith.constant 0 : index
    %37 = vector.load %arg10[%c0_19, %c0_20] : memref<8x128xf32, #tpu.memory_space<vmem>>, vector<8x128xf32>
    %38 = vector.broadcast %27 : vector<8x1xf32> to vector<8x128xf32>
    %39 = arith.mulf %38, %37 : vector<8x128xf32>
    %cst_21 = arith.constant dense<0.000000e+00> : vector<8x128xf32>
    %40 = tpu.matmul %30, %10, %cst_21 {dimension_numbers = #tpu.dot_dimension_numbers<[1], [0], [0], [1], [0, 0, 1, 1], [], []>} : vector<8x128xf32>, vector<128x128xf32>, vector<8x128xf32> -> vector<8x128xf32>
    %41 = arith.addf %39, %40 : vector<8x128xf32>
    %c0_22 = arith.constant 0 : index
    %c0_23 = arith.constant 0 : index
    %42 = vector.load %arg10[%c0_22, %c0_23] : memref<8x128xf32, #tpu.memory_space<vmem>>, vector<8x128xf32>
    tpu.vector_store %arg10[%c0_22, %c0_23], %41 {strides = array<i32>} : memref<8x128xf32, #tpu.memory_space<vmem>>, vector<8x128xf32>,
    %c0_24 = arith.constant 0 : index
    %c0_25 = arith.constant 0 : index
    %43 = vector.load %arg8[%c0_24, %c0_25] : memref<8x1xf32, #tpu.memory_space<vmem>>, vector<8x1xf32>
    tpu.vector_store %arg8[%c0_24, %c0_25], %25 {strides = array<i32>} : memref<8x1xf32, #tpu.memory_space<vmem>>, vector<8x1xf32>,
    %c0_i32_26 = arith.constant 0 : i32
    %44 = arith.cmpi eq, %arg2, %c0_i32_26 : i32
    %45 = arith.extui %44 : i1 to i32
    %c0_i32_27 = arith.constant 0 : i32
    %46 = arith.cmpi ne, %45, %c0_i32_27 : i32
    scf.if %46 {
      %c0_28 = arith.constant 0 : index
      %c0_29 = arith.constant 0 : index
      %47 = vector.load %arg9[%c0_28, %c0_29] : memref<8x1xf32, #tpu.memory_space<vmem>>, vector<8x1xf32>
      %48 = tpu.reciprocal %47 {approx = true} : vector<8x1xf32> -> vector<8x1xf32>
      %49 = arith.mulf %47, %48 : vector<8x1xf32>
      %cst_30 = arith.constant 2.000000e+00 : f32
      %50 = vector.broadcast %cst_30 : f32 to vector<8x1xf32>
      %51 = arith.subf %50, %49 : vector<8x1xf32>
      %52 = arith.mulf %48, %51 : vector<8x1xf32>
      %53 = arith.mulf %47, %52 : vector<8x1xf32>
      %cst_31 = arith.constant 2.000000e+00 : f32
      %54 = vector.broadcast %cst_31 : f32 to vector<8x1xf32>
      %55 = arith.subf %54, %53 : vector<8x1xf32>
      %56 = arith.mulf %52, %55 : vector<8x1xf32>
      %c0_32 = arith.constant 0 : index
      %c0_33 = arith.constant 0 : index
      %57 = vector.load %arg10[%c0_32, %c0_33] : memref<8x128xf32, #tpu.memory_space<vmem>>, vector<8x128xf32>
      %58 = vector.broadcast %56 : vector<8x1xf32> to vector<8x128xf32>
      %59 = arith.mulf %57, %58 : vector<8x128xf32>
      %c0_34 = arith.constant 0 : index
      %c0_35 = arith.constant 0 : index
      %c0_36 = arith.constant 0 : index
      %60 = vector.load %arg7[%c0_34, %c0_35, %c0_36] : memref<1x8x128xf32, #tpu.memory_space<vmem>>, vector<1x8x128xf32>
      %61 = vector.shape_cast %60 : vector<1x8x128xf32> to vector<8x128xf32>
      %62 = vector.shape_cast %59 : vector<8x128xf32> to vector<1x8x128xf32>
      tpu.vector_store %arg7[%c0_34, %c0_35, %c0_36], %62 {strides = array<i32>} : memref<1x8x128xf32, #tpu.memory_space<vmem>>, vector<1x8x128xf32>,
    } else {
    }
    return
  }
  func.func @transform_0(%arg0: i32, %arg1: i32, %arg2: i32, %arg3: memref<2xi32, #tpu.memory_space<smem>>) -> (i32, i32, i32) {
    %c0_i32 = arith.constant 0 : i32
    %c0_i32_0 = arith.constant 0 : i32
    return %arg0, %arg1, %c0_i32 : i32, i32, i32
  }
  func.func @transform_1(%arg0: i32, %arg1: i32, %arg2: i32, %arg3: memref<2xi32, #tpu.memory_space<smem>>) -> (i32, i32, i32) {
    %c0_i32 = arith.constant 0 : i32
    %c0_i32_0 = arith.constant 0 : i32
    return %arg0, %arg2, %c0_i32 : i32, i32, i32
  }
  func.func @transform_2(%arg0: i32, %arg1: i32, %arg2: i32, %arg3: memref<2xi32, #tpu.memory_space<smem>>) -> (i32, i32, i32) {
    %c0_i32 = arith.constant 0 : i32
    %c0_i32_0 = arith.constant 0 : i32
    return %arg0, %arg2, %c0_i32 : i32, i32, i32
  }
  func.func @transform_3(%arg0: i32, %arg1: i32, %arg2: i32, %arg3: memref<2xi32, #tpu.memory_space<smem>>) -> (i32, i32, i32) {
    %c0_i32 = arith.constant 0 : i32
    %c0_i32_0 = arith.constant 0 : i32
    return %arg0, %arg1, %c0_i32 : i32, i32, i32
  }
}

</mosaic_0001>

<bundles_post_ra>
// kernel: tpu_custom_call.1
= control target key start
LH: loop header
LB: loop body
LE: loop exit
PB: predicated region body
PF: predicated region fallthrough
CT: control target
= control target key end

     0   :  { %s1522_s0 = inlined_call_operand.hbm [shape: s32[2], index: 0, kind: input, shape index: {}]   ;;  %s1523_s1 = inlined_call_operand.hbm [shape: f32[2,8,128], index: 1, kind: input, shape index: {}]   ;;  %s1524_s2 = inlined_call_operand.hbm [shape: f32[2,128,128], index: 2, kind: input, shape index: {}]   ;;  %s1525_s3 = inlined_call_operand.hbm [shape: f32[2,128,128], index: 3, kind: input, shape index: {}]   ;;  %s1526_s4 = inlined_call_operand.hbm [shape: f32[2,8,128], index: 4, kind: output, shape index: {}]  }
   0x1   :  { %1534 = sst [smem:[#allocation21_spill]] %s1524_s2  ;;  %s954_s17 = scalar_lea.hbm %s1522_s0, 16 }
   0x2   :  { %p955_p0 = scmp.ne.s32.totalorder %s1522_s0, %s954_s17  ;;  %p958_p1 = scmp.lt.u32.totalorder %s954_s17, %s1522_s0 }
   0x4   :  { %p960_p2 = pnand %p958_p1, %p955_p0 }
   0x6   :  { %963 = shalt.err (!%p960_p2)  }
   0x7   :  { %s1144_s22 = smov [#allocation6]  }
   0x8   :  { %10 = dma.hbm_to_smem %s1522_s0, 16, %s1144_s22, [#allocation5] }
   0x9   :  { %1106 = dma.done.wait [#allocation5], 16 }
   0xa   :  { %1107 = vsyncadd [#allocation5], 4294967280 }
   0xb   :  { %12 = sfence }
   0xc   :  { %13 = vsyncpa [#allocation8], 0 }
   0xd   :  { %15 = vsyncpa [#allocation8 + $0x1], 0 }
   0xe   :  { %16 = vsyncpa [#allocation11], 0 }
   0xf   :  { %18 = vsyncpa [#allocation11 + $0x1], 0 }
  0x10   :  { %19 = vsyncpa [#allocation9], 0 }
  0x11   :  { %21 = vsyncpa [#allocation9 + $0x1], 0  ;;  %s1193_s25 = smov 0   ;;  %s1195_s26 = smov 0  }
  0x12   :  { %s1197_s27 = smov 0   ;;  %s1199_s28 = smov 0  }
  0x13   :  { %s1201_s29 = smov 0   ;;  %s1203_s0 = smov 0  }
  0x14 LB: > { %1535 = sst [smem:[#allocation18_spill]] %s1130_s27  ;;  %s1224_s30 = sadd.s32 4294967295, %s1142_s0   ;;  %s1142_s0 = sphi %s1203_s0, %s27_s0   ;;  %s1138_s29 = sphi %s1201_s29, %s1559_s29   ;;  %s1134_s28 = sphi %s1199_s28, %s1558_s28   ;;  %s1130_s27 = sphi %s1197_s27, %s1554_s27   ;;  %s1126_s26 = sphi %s1195_s26, %s1557_s26   ;;  %s1122_s25 = sphi %s1193_s25, %s1556_s25  }
  0x15   : > { %s692_s5 = sadd.s32 4294967294, %s1142_s0   ;;  %s46_s6 = sadd.s32 1, %s1138_s29 }
  0x16   : > { %s55_s7 = sadd.s32 1, %s1130_s27  ;;  %p48_p3 = scmp.ge.s32.totalorder %s46_s6, 2 }
  0x17   : > { %p62_p4 = scmp.ne.s32.totalorder %s1130_s27, %s1126_s26  ;;  %p63_p5 = scmp.eq.s32.totalorder %s1142_s0, 0 }
  0x18   : > { %p68_p6 = scmp.ne.s32.totalorder %s1126_s26, %s1122_s25  ;;  %s1561_s6 = smov (%p48_p3, %s46_s6), 0 }
  0x19   : > { %1536 = sst [smem:[#allocation19_spill]] %s1561_s6  ;;  %p1236_p7 = por %p63_p5, %p62_p4 }
  0x1a   : > { %p69_p8 = scmp.eq.s32.totalorder %s1224_s30, 0  ;;  %s50_s9 = ssub.s32 %s1138_s29, %s1561_s6 }
  0x1b   : > { %p150_p9 = scmp.eq.s32.totalorder %s1224_s30, 1  ;;  %p53_p10 = scmp.eq.s32.totalorder %s50_s9, 0 }
  0x1c   : > { %p1244_p11 = por %p69_p8, %p68_p6  ;;  %p156_p13 = scmp.eq.s32.totalorder %s692_s5, 1 }
  0x1d   : > { %p1248_p12 = por %p150_p9, %p62_p4  ;;  %p888_p2 = scmp.lt.s32.totalorder %s1142_s0, 2 }
  0x1e   : > { %s1538_s10 = scalar_select %p1244_p11, 1, 0 }
  0x1f   : > { %s1539_s11 = scalar_select %p1248_p12, 1, 0 }
  0x20   : > { %s1253_s12 = scalar_select %p53_p10, %s1130_s27, %s55_s7  }
  0x21   : > { %p1255_p0 = por %p156_p13, %p68_p6  ;;  %s1262_s14 = sand.u32 1, %s1130_s27  }
  0x22   : > { %1540 = sst [smem:[#allocation20_spill]] %s1253_s12  ;;  %s195_s15 = sand.u32 1, %s1142_s0  }
  0x23   : > { %s1541_s13 = scalar_select %p1255_p0, 1, 0 }
  0x24   : > { %s697_s16 = sshll.u32 %s1262_s14, 7  ;;  %p1268_p3 = pnand %p888_p2, %p1236_p7 }
  0x25   : > { %s712_s18 = sshll.u32 %s1138_s29, 11  ;;  %s1543_s2 = sld [smem:[#allocation21_spill]] }
  0x26   : > { %s1542_s17 = scalar_select %p1268_p3, 1, 0 }
  0x27   : > { %s199_s22 = scalar_lea.vmem [#allocation10], %s697_s16  ;;  %s1284_s24 = scalar_lea.sflag [#allocation11], %s195_s15 }
  0x28   : > { %s208_s23 = sshll.u32 %s199_s22, 4  ;;  %p1290_p5 = pneg %p1268_p3  ;;  %s1282_s23 = int_to_ptr.vmem [resolvable:$true] %s208_s23 }
  0x2b   : > { %s1278_s21 = scalar_lea.hbm %s1543_s2, %s712_s18  ;;  %s969_s19 = scalar_lea.hbm %s1543_s2, 4096 }
  0x2c   : > { %s964_s5 = scalar_lea.hbm %s1278_s21, 2048  ;;  %p970_p8 = scmp.lt.u32.totalorder %s1278_s21, %s1543_s2 }
  0x2d   : > { %p965_p4 = scmp.ne.s32.totalorder %s1278_s21, %s964_s5  ;;  %p971_p9 = scmp.lt.u32.totalorder %s969_s19, %s964_s5 }
  0x2e   : > { %p973_p13 = scmp.lt.u32.totalorder %s964_s5, %s1278_s21 }
  0x2f   : > { %p967_p6 = pnand %p1290_p5, %p965_p4  ;;  %p972_p10 = por %p971_p9, %p970_p8 }
  0x31   : > { %p968_p7 = pneg %p967_p6  ;;  %p974_p2 = por %p973_p13, %p972_p10 }
  0x33   : > { %p975_p1 = pnand %p974_p2, %p968_p7 }
  0x35   : > { %978 = shalt.err (!%p975_p1)
}
  0x36   : > { %s979_s15 = scalar_lea.vmem %s1282_s23, 2048  ;;  %s1145_s8 = smov [#allocation10]  }
  0x37   : > { %p980_p4 = scmp.ne.s32.totalorder %s1282_s23, %s979_s15  ;;  %s984_s9 = sshll.u32 %s1145_s8, 4  ;;  %s985_s9 = int_to_ptr.vmem [resolvable:$false] %s984_s9 }
  0x38   : > { %s986_s20 = scalar_lea.vmem %s985_s9, 4096  ;;  %p987_p12 = scmp.lt.s32.totalorder %s1282_s23, %s985_s9 }
  0x39   : > { %p982_p6 = pnand %p980_p4, %p1290_p5  ;;  %p988_p11 = scmp.lt.s32.totalorder %s986_s20, %s979_s15 }
  0x3b   : > { %p983_p0 = pneg %p982_p6  ;;  %p989_p8 = por %p988_p11, %p987_p12 }
  0x3d   : > { %p990_p9 = pnand %p989_p8, %p983_p0 }
  0x3f   : > { %993 = shalt.err (!%p990_p9)
}
  0x40   : > { %s1531_s5 = smov 128   ;;  %s1147_s19 = smov 8  }
  0x41   : > { %880 = dma.hbm_to_vmem [thread:$0]  (!%p1268_p3), %s1278_s21, 2048, %s1282_s23, %s1284_s24, %s1531_s5, %s1531_s5, %s1147_s19  }
  0x42   : > { %s1322_s8 = scalar_lea.hbm %s1525_s3, %s712_s18  ;;  %p703_p11 = scmp.ge.s32.totalorder %s1142_s0, 1 }
  0x43   : > { %s222_s9 = scalar_lea.vmem [#allocation12], %s697_s16  ;;  %p239_p12 = scmp.lt.s32.totalorder %s1142_s0, 3 }
  0x44   : > { %s231_s20 = sshll.u32 %s222_s9, 4  ;;  %s695_s6 = sshll.u32 %s1262_s14, 3  ;;  %s1339_s20 = int_to_ptr.vmem [resolvable:$true] %s231_s20 }
  0x45   : > { %p1328_p0 = pnand %p703_p11, %p239_p12  ;;  %s696_s12 = sshll.u32 %s1138_s29, 7 }
  0x46   : > { %s1337_s23 = scalar_lea.hbm %s1523_s1, %s696_s12  ;;  %s180_s16 = scalar_lea.vmem [#allocation7], %s695_s6 }
  0x47   : > { %s1545_s2 = scalar_select %p1328_p0, 1, 0 }
  0x48   : > { %s188_s18 = sshll.u32 %s180_s16, 4  ;;  %s177_s22 = scalar_lea.sflag [#allocation8], %s1262_s14  ;;  %s189_s18 = int_to_ptr.vmem [resolvable:$true] %s188_s18 }
  0x49   : > { %s994_s15 = scalar_lea.hbm %s1337_s23, 128  ;;  %s999_s27 = scalar_lea.hbm %s1523_s1, 256 }
  0x4a   : > { %p995_p1 = scmp.ne.s32.totalorder %s1337_s23, %s994_s15  ;;  %p1000_p13 = scmp.lt.u32.totalorder %s1337_s23, %s1523_s1 }
  0x4b   : > { %p1001_p2 = scmp.lt.u32.totalorder %s999_s27, %s994_s15  ;;  %p1003_p6 = scmp.lt.u32.totalorder %s994_s15, %s1337_s23 }
  0x4c   : > { %p997_p7 = pnand %p995_p1, %p1290_p5 }
  0x4d   : > { %p1002_p4 = por %p1001_p2, %p1000_p13 }
  0x4e   : > { %p998_p10 = pneg %p997_p7 }
  0x4f   : > { %p1004_p8 = por %p1003_p6, %p1002_p4 }
  0x51   : > { %p1005_p9 = pnand %p1004_p8, %p998_p10 }
  0x53   : > { %1008 = shalt.err (!%p1005_p9)
}
  0x54   : > { %s1009_s6 = scalar_lea.vmem %s189_s18, 128  ;;  %s1148_s14 = smov [#allocation7]  }
  0x55   : > { %p1010_p11 = scmp.ne.s32.totalorder %s189_s18, %s1009_s6  ;;  %s1014_s16 = sshll.u32 %s1148_s14, 4  ;;  %s1015_s16 = int_to_ptr.vmem [resolvable:$false] %s1014_s16 }
  0x56   : > { %s1016_s5 = scalar_lea.vmem %s1015_s16, 256  ;;  %p1017_p7 = scmp.lt.s32.totalorder %s189_s18, %s1015_s16 }
  0x57   : > { %p1012_p12 = pnand %p1010_p11, %p1290_p5  ;;  %p1018_p0 = scmp.lt.s32.totalorder %s1016_s5, %s1009_s6 }
  0x59   : > { %p1013_p1 = pneg %p1012_p12  ;;  %p1019_p3 = por %p1018_p0, %p1017_p7 }
  0x5b   : > { %p1020_p2 = pnand %p1019_p3, %p1013_p1 }
  0x5d   : > { %1023 = shalt.err (!%p1020_p2)
}
  0x5e   : > { %p1546_p13 = scmp.ne.s32.totalorder %s1542_s17, 0  ;;  %s1024_s15 = scalar_lea.hbm %s1322_s8, 2048 }
  0x5f   : > { %p1025_p10 = scmp.ne.s32.totalorder %s1322_s8, %s1024_s15  ;;  %s1029_s12 = scalar_lea.hbm %s1525_s3, 4096 }
  0x60   : > { %877 = dma.hbm_to_vmem [thread:$0]  (!%p1546_p13), %s1337_s23, 128, %s189_s18, %s177_s22  }
  0x61   : > { %p1027_p4 = pnand %p1025_p10, %p1290_p5  ;;  %p1030_p3 = scmp.lt.u32.totalorder %s1322_s8, %s1525_s3 }
  0x62   : > { %p1031_p0 = scmp.lt.u32.totalorder %s1029_s12, %s1024_s15  ;;  %p1033_p9 = scmp.lt.u32.totalorder %s1024_s15, %s1322_s8 }
  0x63   : > { %p1028_p6 = pneg %p1027_p4 }
  0x64   : > { %p1032_p8 = por %p1031_p0, %p1030_p3 }
  0x66   : > { %p1034_p11 = por %p1033_p9, %p1032_p8 }
  0x68   : > { %p1035_p12 = pnand %p1034_p11, %p1028_p6 }
  0x6a   : > { %1038 = shalt.err (!%p1035_p12)
}
  0x6b   : > { %s1039_s23 = scalar_lea.vmem %s1339_s20, 2048  ;;  %s1149_s18 = smov [#allocation12]  }
  0x6c   : > { %p1040_p1 = scmp.ne.s32.totalorder %s1339_s20, %s1039_s23  ;;  %s1044_s22 = sshll.u32 %s1149_s18, 4  ;;  %s1045_s22 = int_to_ptr.vmem [resolvable:$false] %s1044_s22 }
  0x6d   : > { %s1046_s14 = scalar_lea.vmem %s1045_s22, 4096  ;;  %p1047_p10 = scmp.lt.s32.totalorder %s1339_s20, %s1045_s22 }
  0x6e   : > { %p1042_p7 = pnand %p1040_p1, %p1290_p5  ;;  %p1048_p4 = scmp.lt.s32.totalorder %s1046_s14, %s1039_s23 }
  0x70   : > { %p1043_p2 = pneg %p1042_p7  ;;  %p1049_p3 = por %p1048_p4, %p1047_p10 }
  0x72   : > { %p1050_p0 = pnand %p1049_p3, %p1043_p2 }
  0x74   : > { %1053 = shalt.err (!%p1050_p0)
}
  0x75   : > { %s1547_s16 = smov 128   ;;  %p1548_p5 = scmp.ne.s32.totalorder %s1545_s2, 0 }
  0x76   : > { %883 = dma.hbm_to_vmem [thread:$0]  (!%p1546_p13), %s1322_s8, 2048, %s1339_s20, %s1284_s24, %s1547_s16, %s1547_s16, %s1147_s19  }
  0x77   : > { %243 = sbr.rel (%p1548_p5) target bundleno = 1016 (0x3f8), region = 32  ;;  %s1387_s7 = sand.u32 (!%p1548_p5), 1, %s1126_s26  }
  0x78   : > { %s704_s5 = sshll.u32 (!%p1548_p5), %s1387_s7, 3  ;;  %s246_s15 = scalar_lea.sflag (!%p1548_p5), [#allocation8], %s1387_s7 }
  0x79   : > { %s1393_s17 = scalar_lea.vmem (!%p1548_p5), [#allocation7], %s704_s5  ;;  %p1549_p6 = scmp.ne.s32.totalorder (!%p1548_p5), %s1538_s10, 0 }
  0x7e   : > { %1109 = dma.done.wait (%p1549_p6), %s246_s15, 128  }
  0x7f   : > { %1111 = vsyncadd (%p1549_p6), %s246_s15, 4294967168  ;;  %s254_s2 = sand.u32 1, %s1224_s30   ;;  %s705_s24 = sshll.u32 %s1387_s7, 7 }
  0x80   : > { %s255_s19 = scalar_lea.sflag [#allocation11], %s254_s2  ;;  %s1403_s8 = scalar_lea.vmem [#allocation10], %s705_s24 }
  0x81   : > { %1113 = dma.done.wait (%p1549_p6), %s255_s19, 4096  }
  0x82   : > { %1115 = vsyncadd (%p1549_p6), %s255_s19, 4294963200  ;;  %vm306_vm0 = vcmask 7168   ;;  %v1150_v0 = vmov 0.0|0.0   ;;  %v1151_v1 = vmov -inf   ;;  %v1152_v2 = vmov 0.0   ;;  %v312_v3 = vld [vmem:[%s1403_s8] sm:$0xff] }
  0x83   : > { %818 = vmatprep.subr.bf16.mxu0 %v1150_v0  ;;  %307 = vst.msk [vmem:[#allocation2] sm:$0xff] %vm306_vm0, %v1151_v1  ;;  %308 = vst.msk [vmem:[#allocation3] sm:$0xff] %vm306_vm0, %v1152_v2  ;;  %842 = vmatprep.subr.bf16.mxu1 %v1150_v0  ;;  %vm1153_vm1 = vmmov 0   ;;  %v313_v4 = vld [vmem:[%s1403_s8 + $0x8] sm:$0xff]  ;;  %v314_v6 = vld [vmem:[%s1403_s8 + $0x10] sm:$0xff]  ;;  %s414_s30 = sld [smem:[#allocation6 + %s1134_s28]]  ;;  %v416_v29 = vlaneseq }
  0x84   : > { %780 = vmatprep.mubr.msk.f32.mxu0 %vm1153_vm1, %v1152_v2  ;;  %815 = vmatprep.mubr.msk.f32.mxu1 %vm1153_vm1, %v1152_v2  ;;  %v819_v5 = vpack.c.bf16 %v313_v4, %v312_v3  ;;  %v315_v7 = vld [vmem:[%s1403_s8 + $0x18] sm:$0xff]  ;;  %v316_v9 = vld [vmem:[%s1403_s8 + $0x20] sm:$0xff]  ;;  %v317_v10 = vld [vmem:[%s1403_s8 + $0x28] sm:$0xff]  ;;  %v1154_v35 = vmov 0   ;;  %s1440_s10 = scalar_lea.vmem [#allocation12], %s705_s24  ;;  %s709_s20 = sshll.u32 %s1134_s28, 7 }
  0x85   : > { %v822_v8 = vpack.c.bf16 %v315_v7, %v314_v6  ;;  %v825_v11 = vpack.c.bf16 %v317_v10, %v316_v9  ;;  %v318_v12 = vld [vmem:[%s1403_s8 + $0x30] sm:$0xff]  ;;  %v319_v13 = vld [vmem:[%s1403_s8 + $0x38] sm:$0xff]  ;;  %v320_v15 = vld [vmem:[%s1403_s8 + $0x40] sm:$0xff]  ;;  %v417_v30 = vand.u32 127, %v416_v29  ;;  %946 = vset.pattern.permute.xlu0 %v1154_v35  ;;  %947 = vset.pattern.permute.xlu1 %v1154_v35  ;;  %s299_s9 = scalar_lea.vmem [#allocation13], %s704_s5  ;;  %s1473_s6 = scalar_lea.hbm %s1526_s4, %s709_s20 }
  0x86   : > { %820 = vmatpush3.bf16.xpose.msra.mxu0 %v819_v5  ;;  %v828_v14 = vpack.c.bf16 %v319_v13, %v318_v12  ;;  %v321_v16 = vld [vmem:[%s1403_s8 + $0x48] sm:$0xff]  ;;  %v322_v18 = vld [vmem:[%s1403_s8 + $0x50] sm:$0xff]  ;;  %v323_v19 = vld [vmem:[%s1403_s8 + $0x58] sm:$0xff]  ;;  %s559_s27 = sshll.u32 %s299_s9, 4  ;;  %s545_s23 = scalar_lea.sflag [#allocation9], %s1387_s7  ;;  %s1475_s27 = int_to_ptr.vmem [resolvable:$true] %s559_s27 }
  0x87   : > { %821 = vmatprep.subr.bf16.mxu0 %v1150_v0  ;;  %v831_v17 = vpack.c.bf16 %v321_v16, %v320_v15  ;;  %v834_v20 = vpack.c.bf16 %v323_v19, %v322_v18  ;;  %v324_v21 = vld [vmem:[%s1403_s8 + $0x60] sm:$0xff]  ;;  %v325_v22 = vld [vmem:[%s1403_s8 + $0x68] sm:$0xff]  ;;  %v326_v24 = vld [vmem:[%s1403_s8 + $0x70] sm:$0xff]  ;;  %s1054_s18 = scalar_lea.vmem %s1475_s27, 128  ;;  %p1550_p8 = scmp.ne.s32.totalorder %s1539_s11, 0 }
  0x88   : > { %v837_v23 = vpack.c.bf16 %v325_v22, %v324_v21  ;;  %v327_v25 = vld [vmem:[%s1403_s8 + $0x78] sm:$0xff]  ;;  %v328_v36 = vld [vmem:[%s1440_s10] sm:$0xff]  ;;  %v329_v37 = vld [vmem:[%s1440_s10 + $0x8] sm:$0xff]  ;;  %p1055_p13 = scmp.ne.s32.totalorder %s1475_s27, %s1054_s18  ;;  %s1155_s28 = smov [#allocation13]  }
  0x89   : > { %v840_v26 = vpack.c.bf16 %v327_v25, %v326_v24  ;;  %v310_v27 = vld [vmem:[%s1393_s17] sm:$0xff]  ;;  %v420_v31 = vstv %s414_s30  ;;  %v843_v39 = vpack.c.bf16 %v329_v37, %v328_v36  ;;  %v332_v42 = vld [vmem:[%s1440_s10 + $0x20] sm:$0xff]  ;;  %v333_v43 = vld [vmem:[%s1440_s10 + $0x28] sm:$0xff]  ;;  %s1058_s22 = sshll.u32 %s1155_s28, 4  ;;  %s1059_s22 = int_to_ptr.vmem [resolvable:$false] %s1058_s22 }
  0x8a   : > { %v311_v28 = vmul.f32 0.70710677, %v310_v27  ;;  %vm421_vm2 = vcmp.lt.s32.totalorder %v417_v30, %v420_v31  ;;  %v330_v38 = vld [vmem:[%s1440_s10 + $0x10] sm:$0xff]  ;;  %v331_v40 = vld [vmem:[%s1440_s10 + $0x18] sm:$0xff]  ;;  %v849_v44 = vpack.c.bf16 %v333_v43, %v332_v42  ;;  %v423_v48 = vld [vmem:[#allocation2] sm:$0xff]  ;;  %p1056_p9 = pnand %p1055_p13, %p1550_p8  ;;  %s1060_s14 = scalar_lea.vmem %s1059_s22, 256 }
  0x8b   : > { %844 = vmatpush3.bf16.msra.mxu1 %v843_v39  ;;  %v846_v41 = vpack.c.bf16 %v331_v40, %v330_v38  ;;  %v334_v45 = vld [vmem:[%s1440_s10 + $0x30] sm:$0xff]  ;;  %v335_v46 = vld [vmem:[%s1440_s10 + $0x38] sm:$0xff]  ;;  %v336_v50 = vld [vmem:[%s1440_s10 + $0x40] sm:$0xff]  ;;  %p1061_p12 = scmp.lt.s32.totalorder %s1475_s27, %s1059_s22  ;;  %p1062_p1 = scmp.lt.s32.totalorder %s1060_s14, %s1054_s18 }
  0x8c   : > { %845 = vmatprep.subr.bf16.mxu1 %v1150_v0  ;;  %v852_v47 = vpack.c.bf16 %v335_v46, %v334_v45  ;;  %v337_v51 = vld [vmem:[%s1440_s10 + $0x48] sm:$0xff]  ;;  %v338_v55 = vld [vmem:[%s1440_s10 + $0x50] sm:$0xff]  ;;  %v339_v56 = vld [vmem:[%s1440_s10 + $0x58] sm:$0xff]  ;;  %p1057_p11 = pneg %p1056_p9 }
  0x8d   : > { %v855_v53 = vpack.c.bf16 %v337_v51, %v336_v50  ;;  %v858_v57 = vpack.c.bf16 %v339_v56, %v338_v55  ;;  %v340_v58 = vld [vmem:[%s1440_s10 + $0x60] sm:$0xff]  ;;  %v341_v59 = vld [vmem:[%s1440_s10 + $0x68] sm:$0xff]  ;;  %v342_v61 = vld [vmem:[%s1440_s10 + $0x70] sm:$0xff]  ;;  %p1063_p7 = por %p1062_p1, %p1061_p12 }
  0x8e   : > { %823 = vmatpush3.bf16.xpose.msra.mxu0 %v822_v8  ;;  %v861_v60 = vpack.c.bf16 %v341_v59, %v340_v58  ;;  %v343_v62 = vld [vmem:[%s1440_s10 + $0x78] sm:$0xff]  ;;  %v438_v7 = vld [vmem:[#allocation3] sm:$0xff] }
  0x8f   : > { %824 = vmatprep.subr.bf16.mxu0 %v1150_v0  ;;  %847 = vmatpush3.bf16.msra.mxu1 %v846_v41  ;;  %v864_v63 = vpack.c.bf16 %v343_v62, %v342_v61  ;;  %p1064_p2 = pnand %p1063_p7, %p1057_p11 }
  0x90   : > { %848 = vmatprep.subr.bf16.mxu1 %v1150_v0 }
  0x93   : > { %850 = vmatpush3.bf16.msra.mxu1 %v849_v44 }
  0x94   : > { %851 = vmatprep.subr.bf16.mxu1 %v1150_v0 }
  0x96   : > { %826 = vmatpush3.bf16.xpose.msra.mxu0 %v825_v11 }
  0x97   : > { %827 = vmatprep.subr.bf16.mxu0 %v1150_v0  ;;  %853 = vmatpush3.bf16.msra.mxu1 %v852_v47 }
  0x98   : > { %854 = vmatprep.subr.bf16.mxu1 %v1150_v0 }
  0x9b   : > { %856 = vmatpush3.bf16.msra.mxu1 %v855_v53 }
  0x9c   : > { %857 = vmatprep.subr.bf16.mxu1 %v1150_v0 }
  0x9e   : > { %829 = vmatpush3.bf16.xpose.msra.mxu0 %v828_v14 }
  0x9f   : > { %830 = vmatprep.subr.bf16.mxu0 %v1150_v0  ;;  %859 = vmatpush3.bf16.msra.mxu1 %v858_v57 }
  0xa0   : > { %860 = vmatprep.subr.bf16.mxu1 %v1150_v0 }
  0xa3   : > { %862 = vmatpush3.bf16.msra.mxu1 %v861_v60 }
  0xa4   : > { %863 = vmatprep.subr.bf16.mxu1 %v1150_v0 }
  0xa6   : > { %832 = vmatpush3.bf16.xpose.msra.mxu0 %v831_v17 }
  0xa7   : > { %833 = vmatprep.subr.bf16.mxu0 %v1150_v0  ;;  %865 = vmatpush3.bf16.msra.mxu1 %v864_v63 }
  0xae   : > { %835 = vmatpush3.bf16.xpose.msra.mxu0 %v834_v20 }
  0xaf   : > { %836 = vmatprep.subr.bf16.mxu0 %v1150_v0 }
  0xb6   : > { %838 = vmatpush3.bf16.xpose.msra.mxu0 %v837_v23 }
  0xb7   : > { %839 = vmatprep.subr.bf16.mxu0 %v1150_v0 }
  0xbe   : > { %841 = vmatpush3.bf16.xpose.msra.mxu0 %v840_v26 }
  0xc5   : > { %781 = vmatmul.mubr.f32.vlgmr.msra.gmra.mrb[0].mxu0 %v311_v28 }
 0x198   : > { %v410_v32 = vpop.f32.mrb[0].mxu0 }
 0x199   : > { %v782_v33 = vpop.f32.mrb[1].mxu0  ;;  %v422_v34 = vsel %vm421_vm2, %v410_v32, -1000000.0 }
 0x19a   : > { %424 = vmax.xlane.f32.xlu0 %v422_v34 }
 0x227   : > { %v425_v49 = vpop.xlane.xlu0 %424 }
 0x228   : > { %v426_v52 = vmax.f32 %v423_v48, %v425_v49 }
 0x22a   : > { %v427_v54 = vsub.f32 %v423_v48, %v426_v52  ;;  %524 = vst.msk [vmem:[#allocation2] sm:$0xff] %vm306_vm0, %v426_v52  ;;  %432 = vperm.xlu0 %946, %v426_v52  }
 0x22c   : > { %v428_v5 = vmul.f32 1.442695, %v427_v54 }
 0x2a9   : > { %v433_v1 = vpop.permute.xlu0 %432 }
 0x2aa   : > { %v435_v2 = vsub.f32 %v422_v34, %v433_v1 }
 0x2ac   : > { %v436_v3 = vmul.f32 1.442695, %v435_v2 }
 0x2ae   : > { %948 = vpow2.f32 %v436_v3 }
 0x2af   : > { %950 = vpow2.f32 %v428_v5 }
 0x2b8   : > { %v949_v4 = vpop.eup %948 }
 0x2b9   : > { %440 = vadd.xlane.f32.xlu1 %v949_v4  ;;  %816 = vmatmul.mubr.f32.vlgmr.msra.gmra.mrb[0].mxu1 %v949_v4  ;;  %v951_v6 = vpop.eup %950 }
 0x2ba   : > { %v439_v8 = vmul.f32 %v951_v6, %v438_v7 }
 0x2ca   : > { %448 = vperm.xlu1 %947, %v951_v6  }
 0x346   : > { %v441_v9 = vpop.xlane.xlu1 %440 }
 0x347   : > { %v442_v10 = vadd.f32 %v441_v9, %v439_v8 }
 0x349   : > { %444 = vst.msk [vmem:[#allocation3] sm:$0xff] %vm306_vm0, %v442_v10 }
 0x34a   : > { %v449_v20 = vpop.permute.xlu1 %448 }
 0x34b   : > { %v451_v21 = vmul.f32 0.0, %v449_v20 }
 0x350   : > { %v528_v0 = vld [vmem:[#allocation3] sm:$0xff] }
 0x351   : > { %952 = vrcp.f32 %v528_v0 }
 0x35b   : > { %v953_v11 = vpop.eup %952 }
 0x35c   : > { %v530_v12 = vmul.f32 %v953_v11, %v528_v0 }
 0x35e   : > { %v531_v13 = vsub.f32 2.0, %v530_v12 }
 0x360   : > { %v532_v14 = vmul.f32 %v953_v11, %v531_v13 }
 0x362   : > { %v533_v15 = vmul.f32 %v532_v14, %v528_v0 }
 0x364   : > { %v534_v16 = vsub.f32 2.0, %v533_v15 }
 0x366   : > { %v535_v17 = vmul.f32 %v534_v16, %v532_v14 }
 0x368   : > { %539 = vperm.xlu1 %947, %v535_v17  }
 0x38c   : > { %v518_v18 = vpop.f32.mrb[0].mxu1 }
 0x38d   : > { %v817_v19 = vpop.f32.mrb[1].mxu1  ;;  %v522_v22 = vadd.f32 %v518_v18, %v451_v21 }
 0x3e7   : > { %v540_v23 = vpop.permute.xlu1 %539 }
 0x3e8   : > { %v542_v24 = vmul.f32 %v540_v23, %v522_v22 }
 0x3ea   : > { %543 = vst [vmem:[%s299_s9] sm:$0xff] %v542_v24 }
 0x3eb   : > { %1067 = shalt.err (!%p1064_p2)
}
 0x3ec   : > { %s1068_s16 = scalar_lea.hbm %s1473_s6, 128  ;;  %s1072_s15 = scalar_lea.hbm %s1526_s4, 256 }
 0x3ed   : > { %p1069_p10 = scmp.ne.s32.totalorder %s1473_s6, %s1068_s16  ;;  %p1073_p0 = scmp.lt.u32.totalorder %s1473_s6, %s1526_s4 }
 0x3ee   : > { %p1074_p5 = scmp.lt.u32.totalorder %s1072_s15, %s1068_s16  ;;  %p1076_p13 = scmp.lt.u32.totalorder %s1068_s16, %s1473_s6 }
 0x3ef   : > { %p1070_p4 = pnand %p1069_p10, %p1550_p8 }
 0x3f0   : > { %p1075_p6 = por %p1074_p5, %p1073_p0 }
 0x3f1   : > { %p1071_p3 = pneg %p1070_p4 }
 0x3f2   : > { %p1077_p9 = por %p1076_p13, %p1075_p6 }
 0x3f4   : > { %p1078_p11 = pnand %p1077_p9, %p1071_p3 }
 0x3f6   : > { %1081 = shalt.err (!%p1078_p11)
}
 0x3f7   : > { %872 = dma.vmem_to_hbm [thread:$0]  (%p1550_p8), %s1475_s27, 128, %s1473_s6, %s545_s23  }
 0x3f8 PF: > { %s571_s24 = sand.u32 1, %s1122_s25   ;;  %p1551_p12 = scmp.ne.s32.totalorder %s1541_s13, 0 }
 0x3f9   : > { %p1552_p1 = scmp.ge.s32.totalorder %s1142_s0, 2  ;;  %s572_s19 = scalar_lea.sflag [#allocation9], %s571_s24 }
 0x3fb   : > { %p885_p7 = pnand %p1552_p1, %p1551_p12 }
 0x3fd   : > { %1117 = dma.done.wait (!%p885_p7), %s572_s19, 128  }
 0x3fe   : > { %1119 = vsyncadd (!%p885_p7), %s572_s19, 4294967168  ;;  %s27_s0 = sadd.s32 1, %s1142_s0   ;;  %s1553_s8 = sld [smem:[#allocation18_spill]] }
 0x3ff   : > { %p24_p2 = scmp.ge.s32.totalorder %s27_s0, 4   ;;  %s1554_s27 = sld [smem:[#allocation20_spill]] }
 0x400   : > { %s1555_s11 = sld [smem:[#allocation19_spill]]  ;;  %s1556_s25 = smov %s1126_s26 }
 0x401   : > { %s1558_s28 = smov %s1138_s29  ;;  %26 = sbr.rel (!%p24_p2) target bundleno = 20 (0x14), region = 109 }
 0x404   : > { %s1557_s26 = smov %s1553_s8 }
 0x406   : > { %s1559_s29 = smov %s1555_s11 }
 0x408   :  { %577 = vsyncpa [#allocation8], 1 }
 0x409   :  { %579 = vsyncpa [#allocation8 + $0x1], 1 }
 0x40a   :  { %580 = vsyncpa [#allocation11], 1 }
 0x40b   :  { %582 = vsyncpa [#allocation11 + $0x1], 1 }
 0x40c   :  { %583 = vsyncpa [#allocation9], 1 }
 0x40d   :  { %585 = vsyncpa [#allocation9 + $0x1], 1 }

</bundles_post_ra>
